<compile_context>
chip_gen: v7x
topology: tpu7x:2x2x1
jax: 0.10.0
libtpu: 0.0.40
codegen_flags: <defaults>
</compile_context>

<pallas_src>
import math

import jax
import jax.numpy as jnp
from jax.experimental import pallas as pl
from jax.experimental.pallas import tpu as pltpu

# ----------------------------- configuration -------------------------------
H = 32              # config.hidden_size
VOCAB = 128         # config.vocab_size (== token_num of the knowledge tables)
MAXPOS = 64         # config.max_position_embeddings
TYPE_VOCAB = 2      # config.type_vocab_size
PAD_ID = 0          # config.pad_token_id
LN_EPS = 1e-12      # config.layer_norm_eps (final LayerNorm)
CAT_LN_EPS = 1e-5   # nn.LayerNorm default eps (cat_ln)
D_PROM, D_COEXP, D_GF, D_PECA = 20, 24, 12, 16   # knowledge feature dims
PACK = 128 // H     # tokens packed per 128-lane vreg row (= 4)
LANES = PACK * H    # = 128

_HI = jax.lax.Precision.HIGHEST


def _mm(a, b):
    return jnp.matmul(a, b, precision=_HI)


def _round_up(x, m):
    return (x + m - 1) // m * m


def _cdiv(a, b):
    return (a + b - 1) // b


# ------------------------------- kernel ------------------------------------
def _embedding_kernel(base_ref, pos_ref, mvar_ref, wproj_ref, vec_ref, o_ref):
    """All operands are lane-dense (rows, 128) with 4 tokens packed per row.

    vec rows: 0 = centered fused cat_fc bias, 1/2 = cat_ln gamma/beta,
              3/4 = final LN gamma/beta  (each tiled x4 across the 128 lanes).
    """
    f32 = jnp.float32
    mvar = mvar_ref[...]                                   # block-diag 1/H "group mean"

    # cat_fc output, already mean-centered per token (mean folded into wrapper + bias).
    hc = base_ref[...].astype(f32) + vec_ref[0:1, :]

    # cat_ln: per-token variance via block-diagonal mean-of-squares matmul (MXU, exact).
    var1 = jnp.dot(hc * hc, mvar, preferred_element_type=f32)
    hn = hc * jax.lax.rsqrt(var1 + CAT_LN_EPS) * vec_ref[1:2, :] + vec_ref[2:3, :]

    # cat_gelu (QuickGELU): x * sigmoid(1.702 x)
    hg = hn * jax.nn.sigmoid(1.702 * hn)

    # cat_proj (block-diagonal, output-mean pre-subtracted) + centered
    # (position + token_type[0] + proj bias) table  ->  e - mean(e) directly.
    ec = jnp.dot(hg, wproj_ref[...], preferred_element_type=f32) + pos_ref[...]

    # final LayerNorm (eps = config.layer_norm_eps)
    var2 = jnp.dot(ec * ec, mvar, preferred_element_type=f32)
    out = ec * jax.lax.rsqrt(var2 + LN_EPS) * vec_ref[3:4, :] + vec_ref[4:5, :]

    # TODO(synk): dropout is identity (eval/inference); train-mode dropout would need
    # the pltpu PRNG.
    o_ref[...] = out.astype(o_ref.dtype)


# --------------------------- tiling helpers ---------------------------------
def _num_tensorcores():
    """Best-effort TensorCore count (v7x has 2 per chip); defaults to 1."""
    try:
        info = pltpu.get_tpu_info()
    except Exception:
        return 1
    for name in ("num_cores", "core_count", "num_tensorcores", "tensorcore_count"):
        v = getattr(info, name, None)
        if isinstance(v, int) and v > 0:
            return v
    return 1


def _choose_tiling(N, S, tile_m_req, ncores):
    """tile_m must be a multiple of S (identical per-tile position pattern) and of
    32 (4-token lane packing with the packed row count a multiple of 8 sublanes)."""
    q = (32 * S) // math.gcd(32, S)          # lcm(32, S)
    n_q = _cdiv(N, q)
    tile_q = max(1, min(max(1, tile_m_req // q), n_q))
    # Only split into >=2 (ideally even) grid steps when there are >=2 TensorCores
    # to feed (v7x); on single-TC v5e/v6e extra grid steps are pure overhead.
    if ncores >= 2 and n_q >= 2:
        steps = _cdiv(n_q, tile_q)
        if steps < 2 or steps % 2:
            steps = max(2, steps + (steps % 2))
            tile_q = max(1, _cdiv(n_q, steps))
    tile_m = tile_q * q
    return tile_m, _round_up(N, tile_m)


def _maybe_buffered_spec(shape, index_map, n_steps):
    """Deep-buffer the dominant input stream when there is a real pipeline."""
    if n_steps >= 3 and hasattr(pl, "Buffered"):
        try:
            return pl.BlockSpec(shape, index_map, pipeline_mode=pl.Buffered(3))
        except TypeError:   # older jax without pipeline_mode kwarg
            pass
    return pl.BlockSpec(shape, index_map)


# ------------------------------- wrapper ------------------------------------
def knowledge_bert_embeddings(params, input_ids, values, species,
                              emb_warmup_alpha=1.0, tile_m=2048,
                              stream_dtype=jnp.float32, out_dtype=jnp.float32):
    """Fused KnowledgeBertEmbeddings forward (eval mode).

    stream_dtype / out_dtype: set to jnp.bfloat16 to halve the per-token HBM streams
    if downstream tolerates ~1e-3 noise (in-kernel math stays f32 either way).
    """
    B, S = input_ids.shape
    N = B * S
    alpha = emb_warmup_alpha
    f32 = jnp.float32

    # ---- fold everything id-dependent into two tiny (VOCAB, H) tables (exact) ----
    wfc = params["cat_fc_w"].astype(f32)                       # (5H+1, H)
    wfc_we = wfc[0:H]
    wfc_val = wfc[H:H + 1]                                     # (1, H)
    wfc1 = wfc[1 * H + 1:2 * H + 1]
    wfc2 = wfc[2 * H + 1:3 * H + 1]
    wfc3 = wfc[3 * H + 1:4 * H + 1]
    wfc4 = wfc[4 * H + 1:5 * H + 1]

    t_word = _mm(params["word_emb"], wfc_we)                                   # (VOCAB, H)
    t_know = (_mm(params["promoter_knowledge"], _mm(params["prom_w"], wfc1))
              + _mm(params["co_exp_knowledge"], _mm(params["coexp_w"], wfc2))
              + _mm(params["gene_family_knowledge"], _mm(params["gf_w"], wfc3))
              + _mm(params["peca_grn_knowledge"], _mm(params["peca_w"], wfc4)))
    t_know = alpha * t_know                                                    # (VOCAB, H)
    b_fused = (params["cat_fc_b"]
               + alpha * (_mm(params["prom_b"], wfc1) + _mm(params["coexp_b"], wfc2)
                          + _mm(params["gf_b"], wfc3) + _mm(params["peca_b"], wfc4)))

    # ---- per-token base stream: gathers + values term, pre-centered over H ----
    species_mask = (species[:, 0] == 1)
    ids_shifted = jnp.where(species_mask[:, None],
                            params["homologous_index"][input_ids], input_ids)
    base = (t_word[input_ids] + t_know[ids_shifted]
            + values[..., None].astype(f32) * wfc_val)                         # (B, S, H)
    base = base - jnp.mean(base, axis=-1, keepdims=True)    # fold cat_ln mean away
    base = base.reshape(N, H)

    # ---- tiling -----------------------------------------------------------
    ncores = _num_tensorcores()
    tile_m, N_pad = _choose_tiling(N, S, int(tile_m), ncores)
    R = tile_m // PACK                       # packed rows per tile (multiple of 8)
    n_steps = N_pad // tile_m

    base = jnp.pad(base, ((0, N_pad - N), (0, 0)))
    base = base.reshape(N_pad // PACK, LANES).astype(stream_dtype)   # lane-dense (., 128)

    # ---- constant operands (fetched into VMEM once: constant index_map) ----
    # centered (position + token_type[0] + cat_proj bias) table, tiled over one tile
    # and packed 4-tokens-per-row.
    # TODO(synk): assumes default token_type_ids (all zeros) and default position_ids
    # with past_key_values_length == 0, as in the module's registered buffers.
    pos_plus = (params["pos_emb"][:S] + params["token_type_emb"][0]
                + params["cat_proj_b"])                                        # (S, H)
    pos_c = pos_plus - jnp.mean(pos_plus, axis=-1, keepdims=True)
    pos_tile = jnp.tile(pos_c, (tile_m // S, 1)).reshape(R, LANES).astype(f32)

    # block-diagonal 1/H "group mean" matrix (exact) for both LN variances, and the
    # block-diagonal cat_proj weight with its output-mean subtraction folded in.
    m_group = jnp.full((H, H), 1.0 / H, f32)
    mvar = jnp.kron(jnp.eye(PACK, dtype=f32), m_group)                         # (128, 128)
    wproj_c = params["cat_proj_w"].astype(f32) - _mm(params["cat_proj_w"].astype(f32),
                                                     m_group)
    wproj_blk = jnp.kron(jnp.eye(PACK, dtype=f32), wproj_c)                    # (128, 128)

    # small per-channel vectors, tiled x4 to 128 lanes, packed into one (8, 128)
    b_fused_c = b_fused - jnp.mean(b_fused)
    vecs = jnp.stack([jnp.tile(b_fused_c, PACK),
                      jnp.tile(params["cat_ln_g"], PACK),
                      jnp.tile(params["cat_ln_b"], PACK),
                      jnp.tile(params["ln_g"], PACK),
                      jnp.tile(params["ln_b"], PACK)], axis=0)
    vecs = jnp.pad(vecs, ((0, 8 - vecs.shape[0]), (0, 0))).astype(f32)

    # ---- pallas call --------------------------------------------------------
    base_spec = _maybe_buffered_spec((R, LANES), lambda i: (i, 0), n_steps)

    out = pl.pallas_call(
        _embedding_kernel,
        out_shape=jax.ShapeDtypeStruct((N_pad // PACK, LANES), out_dtype),
        grid=(n_steps,),
        in_specs=[
            base_spec,                                        # per-token base stream
            pl.BlockSpec((R, LANES), lambda i: (0, 0)),       # pos(+tok+bias) table
            pl.BlockSpec((LANES, LANES), lambda i: (0, 0)),   # group-mean matrix
            pl.BlockSpec((LANES, LANES), lambda i: (0, 0)),   # block-diag cat_proj
            pl.BlockSpec((8, LANES), lambda i: (0, 0)),       # packed bias/gain vectors
        ],
        out_specs=pl.BlockSpec((R, LANES), lambda i: (i, 0)),
        compiler_params=pltpu.CompilerParams(dimension_semantics=("parallel",)),
    )(base, pos_tile, mvar, wproj_blk, vecs)

    return out.reshape(N_pad, H)[:N].reshape(B, S, H)


# ----------------------- pure-JAX reference (PyTorch semantics) -------------
def reference(params, input_ids, values, species, alpha=1.0):
    B, S = input_ids.shape
    species_mask = (species[:, 0] == 1)
    ids_shifted = jnp.where(species_mask[:, None],
                            params["homologous_index"][input_ids], input_ids)
    we = params["word_emb"][input_ids]
    val = values[..., None].astype(jnp.float32)
    x = jnp.concatenate([we, val], axis=2)
    for kname, wname, bname in (("promoter_knowledge", "prom_w", "prom_b"),
                                ("co_exp_knowledge", "coexp_w", "coexp_b"),
                                ("gene_family_knowledge", "gf_w", "gf_b"),
                                ("peca_grn_knowledge", "peca_w", "peca_b")):
        k = params[kname][ids_shifted]
        p = _mm(k, params[wname]) + params[bname]
        x = jnp.concatenate([x, alpha * p], axis=2)
    h = _mm(x, params["cat_fc_w"]) + params["cat_fc_b"]
    mu = h.mean(-1, keepdims=True)
    var = ((h - mu) ** 2).mean(-1, keepdims=True)
    hn = (h - mu) / jnp.sqrt(var + CAT_LN_EPS) * params["cat_ln_g"] + params["cat_ln_b"]
    hg = hn * jax.nn.sigmoid(1.702 * hn)
    e = _mm(hg, params["cat_proj_w"]) + params["cat_proj_b"]
    tok = params["token_type_emb"][jnp.zeros((B, S), jnp.int32)]
    pos = params["pos_emb"][jnp.arange(S)][None]
    e = e + tok + pos
    mu2 = e.mean(-1, keepdims=True)
    var2 = ((e - mu2) ** 2).mean(-1, keepdims=True)
    return (e - mu2) / jnp.sqrt(var2 + LN_EPS) * params["ln_g"] + params["ln_b"]


# ------------------------------ param init ----------------------------------
def init_params(key):
    ks = iter(jax.random.split(key, 32))
    n = lambda shape, s=0.02: (s * jax.random.normal(next(ks), shape)).astype(jnp.float32)

    word_emb = n((VOCAB, H))
    word_emb = word_emb.at[PAD_ID].set(0.0)        # padding_idx row is zero

    # homologous_index = arange(token_num) with a few human->mouse overrides
    homologous_index = jnp.arange(VOCAB, dtype=jnp.int32)
    homologous_index = homologous_index.at[jnp.array([5, 7, 20])].set(
        jnp.array([10, 3, 21], dtype=jnp.int32))

    return dict(
        word_emb=word_emb,
        pos_emb=n((MAXPOS, H)),
        token_type_emb=n((TYPE_VOCAB, H)),
        promoter_knowledge=n((VOCAB, D_PROM), 1.0),
        co_exp_knowledge=n((VOCAB, D_COEXP), 1.0),
        gene_family_knowledge=n((VOCAB, D_GF), 1.0),
        peca_grn_knowledge=n((VOCAB, D_PECA), 1.0),
        homologous_index=homologous_index,
        prom_w=n((D_PROM, H)), prom_b=n((H,)),
        coexp_w=n((D_COEXP, H)), coexp_b=n((H,)),
        gf_w=n((D_GF, H)), gf_b=n((H,)),
        peca_w=n((D_PECA, H)), peca_b=n((H,)),
        cat_fc_w=n((5 * H + 1, H)), cat_fc_b=n((H,)),
        cat_ln_g=jnp.ones((H,), jnp.float32), cat_ln_b=jnp.zeros((H,), jnp.float32),
        cat_proj_w=n((H, H)), cat_proj_b=n((H,)),
        ln_g=jnp.ones((H,), jnp.float32), ln_b=jnp.zeros((H,), jnp.float32),
    )


# --------------------------------- main --------------------------------------
if __name__ == "__main__":
    key = jax.random.PRNGKey(0)
    kp, ki, kv, ki2, kv2 = jax.random.split(key, 5)
    params = init_params(kp)

    # -- case 1: tiny shapes (B=2, S=8, H=32), single grid step -----------------
    B, S = 2, 8
    input_ids = jax.random.randint(ki, (B, S), 1, VOCAB, dtype=jnp.int32)
    values = jax.random.normal(kv, (B, S), dtype=jnp.float32)
    species = jnp.array([[0], [1]], dtype=jnp.int32)     # second row uses homologous ids

    out = knowledge_bert_embeddings(params, input_ids, values, species,
                                    emb_warmup_alpha=1.0)
    out = jax.block_until_ready(out)
    ref = reference(params, input_ids, values, species, alpha=1.0)
    assert out.shape == (B, S, H)
    assert jnp.allclose(out, ref, atol=2e-4, rtol=2e-4), "mismatch vs reference (case 1)"

    # -- case 2: multi-tile (B=4, S=64, tile_m=64 -> 4 grid steps, pipelined) ----
    B2, S2 = 4, 64
    input_ids2 = jax.random.randint(ki2, (B2, S2), 1, VOCAB, dtype=jnp.int32)
    values2 = jax.random.normal(kv2, (B2, S2), dtype=jnp.float32)
    species2 = jnp.array([[0], [1], [0], [1]], dtype=jnp.int32)

    out2 = knowledge_bert_embeddings(params, input_ids2, values2, species2,
                                     emb_warmup_alpha=0.5, tile_m=64)
    out2 = jax.block_until_ready(out2)
    ref2 = reference(params, input_ids2, values2, species2, alpha=0.5)
    assert out2.shape == (B2, S2, H)
    assert jnp.allclose(out2, ref2, atol=2e-4, rtol=2e-4), "mismatch vs reference (case 2)"

    print("KERNEL_OK")
</pallas_src>

<mosaic_0001>
module attributes {stable_mosaic.version = 11 : i64} {
  func.func @_embedding_kernel(%arg0: i32, %arg1: memref<8x128xf32, #tpu.memory_space<vmem>>, %arg2: memref<8x128xf32, #tpu.memory_space<vmem>>, %arg3: memref<128x128xf32, #tpu.memory_space<vmem>>, %arg4: memref<128x128xf32, #tpu.memory_space<vmem>>, %arg5: memref<8x128xf32, #tpu.memory_space<vmem>>, %arg6: memref<8x128xf32, #tpu.memory_space<vmem>>) attributes {dimension_semantics = [#tpu.dimension_semantics<parallel>], iteration_bounds = array<i64: 1>, scalar_prefetch = 0 : i64, scratch_operands = 0 : i64, tpu.core_type = #tpu.core_type<tc>, window_params = [{transform_indices = @transform_0, window_bounds = array<i64: 8, 128>}, {pipeline_mode = #tpu.pipeline_mode<synchronous>, transform_indices = @transform_1, window_bounds = array<i64: 8, 128>}, {pipeline_mode = #tpu.pipeline_mode<synchronous>, transform_indices = @transform_2, window_bounds = array<i64: 128, 128>}, {pipeline_mode = #tpu.pipeline_mode<synchronous>, transform_indices = @transform_3, window_bounds = array<i64: 128, 128>}, {pipeline_mode = #tpu.pipeline_mode<synchronous>, transform_indices = @transform_4, window_bounds = array<i64: 8, 128>}, {transform_indices = @transform_5, window_bounds = array<i64: 8, 128>}]} {
    %c0 = arith.constant 0 : index
    %c0_0 = arith.constant 0 : index
    %0 = vector.load %arg3[%c0, %c0_0] : memref<128x128xf32, #tpu.memory_space<vmem>>, vector<128x128xf32>
    %c0_1 = arith.constant 0 : index
    %c0_2 = arith.constant 0 : index
    %1 = vector.load %arg1[%c0_1, %c0_2] : memref<8x128xf32, #tpu.memory_space<vmem>>, vector<8x128xf32>
    %c0_3 = arith.constant 0 : index
    %c0_4 = arith.constant 0 : index
    %2 = vector.load %arg5[%c0_3, %c0_4] : memref<8x128xf32, #tpu.memory_space<vmem>>, vector<1x128xf32>
    %3 = vector.broadcast %2 : vector<1x128xf32> to vector<8x128xf32>
    %4 = arith.addf %1, %3 : vector<8x128xf32>
    %5 = arith.mulf %4, %4 : vector<8x128xf32>
    %cst = arith.constant dense<0.000000e+00> : vector<8x128xf32>
    %6 = tpu.matmul %5, %0, %cst {dimension_numbers = #tpu.dot_dimension_numbers<[1], [0], [0], [1], [0, 0, 1, 1], [], []>} : vector<8x128xf32>, vector<128x128xf32>, vector<8x128xf32> -> vector<8x128xf32>
    %cst_5 = arith.constant 9.99999974E-6 : f32
    %7 = vector.broadcast %cst_5 : f32 to vector<8x128xf32>
    %8 = arith.addf %6, %7 : vector<8x128xf32>
    %9 = math.rsqrt %8 : vector<8x128xf32>
    %10 = arith.mulf %4, %9 : vector<8x128xf32>
    %c1 = arith.constant 1 : index
    %c0_6 = arith.constant 0 : index
    %11 = vector.load %arg5[%c1, %c0_6] : memref<8x128xf32, #tpu.memory_space<vmem>>, vector<1x128xf32>
    %12 = vector.broadcast %11 : vector<1x128xf32> to vector<8x128xf32>
    %13 = arith.mulf %10, %12 : vector<8x128xf32>
    %c2 = arith.constant 2 : index
    %c0_7 = arith.constant 0 : index
    %14 = vector.load %arg5[%c2, %c0_7] : memref<8x128xf32, #tpu.memory_space<vmem>>, vector<1x128xf32>
    %15 = vector.broadcast %14 : vector<1x128xf32> to vector<8x128xf32>
    %16 = arith.addf %13, %15 : vector<8x128xf32>
    %cst_8 = arith.constant 1.702000e+00 : f32
    %17 = vector.broadcast %cst_8 : f32 to vector<8x128xf32>
    %18 = arith.mulf %17, %16 : vector<8x128xf32>
    %19 = arith.negf %18 : vector<8x128xf32>
    %20 = math.exp %19 : vector<8x128xf32>
    %cst_9 = arith.constant 1.000000e+00 : f32
    %21 = vector.broadcast %cst_9 : f32 to vector<8x128xf32>
    %22 = arith.addf %21, %20 : vector<8x128xf32>
    %23 = arith.divf %21, %22 : vector<8x128xf32>
    %24 = arith.mulf %16, %23 : vector<8x128xf32>
    %c0_10 = arith.constant 0 : index
    %c0_11 = arith.constant 0 : index
    %25 = vector.load %arg4[%c0_10, %c0_11] : memref<128x128xf32, #tpu.memory_space<vmem>>, vector<128x128xf32>
    %cst_12 = arith.constant dense<0.000000e+00> : vector<8x128xf32>
    %26 = tpu.matmul %24, %25, %cst_12 {dimension_numbers = #tpu.dot_dimension_numbers<[1], [0], [0], [1], [0, 0, 1, 1], [], []>} : vector<8x128xf32>, vector<128x128xf32>, vector<8x128xf32> -> vector<8x128xf32>
    %c0_13 = arith.constant 0 : index
    %c0_14 = arith.constant 0 : index
    %27 = vector.load %arg2[%c0_13, %c0_14] : memref<8x128xf32, #tpu.memory_space<vmem>>, vector<8x128xf32>
    %28 = arith.addf %26, %27 : vector<8x128xf32>
    %29 = arith.mulf %28, %28 : vector<8x128xf32>
    %cst_15 = arith.constant dense<0.000000e+00> : vector<8x128xf32>
    %30 = tpu.matmul %29, %0, %cst_15 {dimension_numbers = #tpu.dot_dimension_numbers<[1], [0], [0], [1], [0, 0, 1, 1], [], []>} : vector<8x128xf32>, vector<128x128xf32>, vector<8x128xf32> -> vector<8x128xf32>
    %cst_16 = arith.constant 9.99999996E-13 : f32
    %31 = vector.broadcast %cst_16 : f32 to vector<8x128xf32>
    %32 = arith.addf %30, %31 : vector<8x128xf32>
    %33 = math.rsqrt %32 : vector<8x128xf32>
    %34 = arith.mulf %28, %33 : vector<8x128xf32>
    %c3 = arith.constant 3 : index
    %c0_17 = arith.constant 0 : index
    %35 = vector.load %arg5[%c3, %c0_17] : memref<8x128xf32, #tpu.memory_space<vmem>>, vector<1x128xf32>
    %36 = vector.broadcast %35 : vector<1x128xf32> to vector<8x128xf32>
    %37 = arith.mulf %34, %36 : vector<8x128xf32>
    %c4 = arith.constant 4 : index
    %c0_18 = arith.constant 0 : index
    %38 = vector.load %arg5[%c4, %c0_18] : memref<8x128xf32, #tpu.memory_space<vmem>>, vector<1x128xf32>
    %39 = vector.broadcast %38 : vector<1x128xf32> to vector<8x128xf32>
    %40 = arith.addf %37, %39 : vector<8x128xf32>
    %c0_19 = arith.constant 0 : index
    %c0_20 = arith.constant 0 : index
    %41 = vector.load %arg6[%c0_19, %c0_20] : memref<8x128xf32, #tpu.memory_space<vmem>>, vector<8x128xf32>
    tpu.vector_store %arg6[%c0_19, %c0_20], %40 {strides = array<i32>} : memref<8x128xf32, #tpu.memory_space<vmem>>, vector<8x128xf32>,
    return
  }
  func.func @transform_0(%arg0: i32) -> (i32, i32) {
    %c0_i32 = arith.constant 0 : i32
    %c0_i32_0 = arith.constant 0 : i32
    return %arg0, %c0_i32 : i32, i32
  }
  func.func @transform_1(%arg0: i32) -> (i32, i32) {
    %c0_i32 = arith.constant 0 : i32
    %c0_i32_0 = arith.constant 0 : i32
    %c0_i32_1 = arith.constant 0 : i32
    return %c0_i32, %c0_i32_0 : i32, i32
  }
  func.func @transform_2(%arg0: i32) -> (i32, i32) {
    %c0_i32 = arith.constant 0 : i32
    %c0_i32_0 = arith.constant 0 : i32
    %c0_i32_1 = arith.constant 0 : i32
    return %c0_i32, %c0_i32_0 : i32, i32
  }
  func.func @transform_3(%arg0: i32) -> (i32, i32) {
    %c0_i32 = arith.constant 0 : i32
    %c0_i32_0 = arith.constant 0 : i32
    %c0_i32_1 = arith.constant 0 : i32
    return %c0_i32, %c0_i32_0 : i32, i32
  }
  func.func @transform_4(%arg0: i32) -> (i32, i32) {
    %c0_i32 = arith.constant 0 : i32
    %c0_i32_0 = arith.constant 0 : i32
    %c0_i32_1 = arith.constant 0 : i32
    return %c0_i32, %c0_i32_0 : i32, i32
  }
  func.func @transform_5(%arg0: i32) -> (i32, i32) {
    %c0_i32 = arith.constant 0 : i32
    %c0_i32_0 = arith.constant 0 : i32
    return %arg0, %c0_i32 : i32, i32
  }
}

</mosaic_0001>

<bundles_post_ra>
// kernel: tpu_custom_call.1
= control target key start
LH: loop header
LB: loop body
LE: loop exit
PB: predicated region body
PF: predicated region fallthrough
CT: control target
= control target key end

     0   :  { %10 = vsyncpa [#allocation3], 0  ;;  %s895_s0 = inlined_call_operand.hbm [shape: f32[8,128], index: 0, kind: input, shape index: {}]   ;;  %s896_s1 = inlined_call_operand.hbm [shape: f32[8,128], index: 1, kind: input, shape index: {}]   ;;  %s897_s2 = inlined_call_operand.hbm [shape: f32[128,128], index: 2, kind: input, shape index: {}]   ;;  %s898_s3 = inlined_call_operand.hbm [shape: f32[128,128], index: 3, kind: input, shape index: {}]   ;;  %s899_s4 = inlined_call_operand.vmem [shape: f32[8,128], index: 4, kind: input, shape index: {}]   ;;  %s900_s5 = inlined_call_operand.hbm [shape: f32[8,128], index: 5, kind: output, shape index: {}]  }
   0x1   :  { %11 = vsyncpa [#allocation6], 0 }
   0x2   :  { %12 = vsyncpa [#allocation9], 0 }
   0x3   :  { %13 = vsyncpa [#allocation4], 0  ;;  %s748_s18 = smov [#allocation5]   ;;  %s749_s20 = smov [#allocation2]  }
   0x4   :  { %s30_s19 = sshll.u32 %s748_s18, 4  ;;  %s20_s21 = sshll.u32 %s749_s20, 4  ;;  %s31_s19 = int_to_ptr.vmem [resolvable:$true] %s30_s19  ;;  %s21_s21 = int_to_ptr.vmem [resolvable:$true] %s20_s21 }
   0x5   :  { %s630_s24 = scalar_lea.hbm %s896_s1, 128 }
   0x6   :  { %p631_p0 = scmp.ne.s32.totalorder %s896_s1, %s630_s24  ;;  %p634_p1 = scmp.lt.u32.totalorder %s630_s24, %s896_s1 }
   0x8   :  { %p636_p2 = pnand %p634_p1, %p631_p0 }
   0xa   :  { %639 = shalt.err (!%p636_p2)
}
   0xb   :  { %s640_s29 = scalar_lea.vmem %s31_s19, 128  ;;  %p645_p4 = scmp.lt.s32.totalorder %s31_s19, %s31_s19 }
   0xc   :  { %p641_p3 = scmp.ne.s32.totalorder %s31_s19, %s640_s29  ;;  %p646_p5 = scmp.lt.s32.totalorder %s640_s29, %s640_s29 }
   0xe   :  { %p647_p6 = por %p646_p5, %p645_p4 }
  0x10   :  { %p648_p7 = pnand %p647_p6, %p641_p3 }
  0x12   :  { %651 = shalt.err (!%p648_p7)
}
  0x13   :  { %33 = dma.hbm_to_vmem [thread:$0]  %s896_s1, 128, %s31_s19, [#allocation6]  }
  0x14   :  { %s652_s9 = scalar_lea.hbm %s895_s0, 128 }
  0x15   :  { %p653_p8 = scmp.ne.s32.totalorder %s895_s0, %s652_s9  ;;  %p656_p9 = scmp.lt.u32.totalorder %s652_s9, %s895_s0 }
  0x17   :  { %p658_p10 = pnand %p656_p9, %p653_p8 }
  0x19   :  { %661 = shalt.err (!%p658_p10)
}
  0x1a   :  { %s662_s14 = scalar_lea.vmem %s21_s21, 128  ;;  %p667_p12 = scmp.lt.s32.totalorder %s21_s21, %s21_s21 }
  0x1b   :  { %p663_p11 = scmp.ne.s32.totalorder %s21_s21, %s662_s14  ;;  %p668_p13 = scmp.lt.s32.totalorder %s662_s14, %s662_s14 }
  0x1d   :  { %p669_p0 = por %p668_p13, %p667_p12 }
  0x1f   :  { %p670_p1 = pnand %p669_p0, %p663_p11 }
  0x21   :  { %673 = shalt.err (!%p670_p1)
}
  0x22   :  { %23 = dma.hbm_to_vmem [thread:$0]  %s895_s0, 128, %s21_s21, [#allocation3]  }
  0x23   :  { %s750_s16 = smov [#allocation7]   ;;  %s674_s20 = scalar_lea.hbm %s897_s2, 2048 }
  0x24   :  { %s39_s17 = sshll.u32 %s750_s16, 4  ;;  %p675_p2 = scmp.ne.s32.totalorder %s897_s2, %s674_s20  ;;  %s40_s17 = int_to_ptr.vmem [resolvable:$true] %s39_s17 }
  0x25   :  { %p678_p3 = scmp.lt.u32.totalorder %s674_s20, %s897_s2 }
  0x27   :  { %p680_p4 = pnand %p678_p3, %p675_p2 }
  0x29   :  { %683 = shalt.err (!%p680_p4)
}
  0x2a   :  { %s684_s26 = scalar_lea.vmem %s40_s17, 2048  ;;  %p689_p6 = scmp.lt.s32.totalorder %s40_s17, %s40_s17 }
  0x2b   :  { %p685_p5 = scmp.ne.s32.totalorder %s40_s17, %s684_s26  ;;  %p690_p7 = scmp.lt.s32.totalorder %s684_s26, %s684_s26 }
  0x2d   :  { %p691_p8 = por %p690_p7, %p689_p6 }
  0x2f   :  { %p692_p9 = pnand %p691_p8, %p685_p5 }
  0x31   :  { %695 = shalt.err (!%p692_p9)
}
  0x32   :  { %s751_s0 = smov 128   ;;  %s752_s21 = smov 8  }
  0x33   :  { %45 = dma.hbm_to_vmem [thread:$0]  %s897_s2, 2048, %s40_s17, [#allocation6], %s751_s0, %s751_s0, %s752_s21  }
  0x34   :  { %s753_s29 = smov [#allocation8]   ;;  %s696_s8 = scalar_lea.hbm %s898_s3, 2048 }
  0x35   :  { %s51_s30 = sshll.u32 %s753_s29, 4  ;;  %p697_p10 = scmp.ne.s32.totalorder %s898_s3, %s696_s8  ;;  %s52_s30 = int_to_ptr.vmem [resolvable:$true] %s51_s30 }
  0x36   :  { %p700_p11 = scmp.lt.u32.totalorder %s696_s8, %s898_s3 }
  0x38   :  { %p702_p12 = pnand %p700_p11, %p697_p10 }
  0x3a   :  { %705 = shalt.err (!%p702_p12)
}
  0x3b   :  { %s706_s13 = scalar_lea.vmem %s52_s30, 2048  ;;  %p711_p0 = scmp.lt.s32.totalorder %s52_s30, %s52_s30 }
  0x3c   :  { %p707_p13 = scmp.ne.s32.totalorder %s52_s30, %s706_s13  ;;  %p712_p1 = scmp.lt.s32.totalorder %s706_s13, %s706_s13 }
  0x3e   :  { %p713_p2 = por %p712_p1, %p711_p0 }
  0x40   :  { %p714_p3 = pnand %p713_p2, %p707_p13 }
  0x42   :  { %717 = shalt.err (!%p714_p3)
}
  0x43   :  { %57 = dma.hbm_to_vmem [thread:$0]  %s898_s3, 2048, %s52_s30, [#allocation9], %s751_s0, %s751_s0, %s752_s21  }
  0x44   :  { %740 = dma.done.wait [#allocation3], 128  }
  0x45   :  { %741 = vsyncadd [#allocation3], 4294967168 }
  0x46   :  { %742 = dma.done.wait [#allocation6], 2176  }
  0x47   :  { %743 = vsyncadd [#allocation6], 4294965120 }
  0x48   :  { %744 = dma.done.wait [#allocation9], 2048  }
  0x49   :  { %745 = vsyncadd [#allocation9], 4294965248  ;;  %v754_v0 = vmov 0.0|0.0   ;;  %vm755_vm0 = vmmov 0   ;;  %v756_v1 = vmov 0.0   ;;  %v72_v2 = vld [vmem:[#allocation7] sm:$0xff] }
  0x4a   :  { %540 = vmatprep.subr.bf16.mxu0 %v754_v0  ;;  %467 = vmatprep.mubr.msk.f32.mxu0 %vm755_vm0, %v756_v1  ;;  %v73_v3 = vld [vmem:[#allocation7 + $0x8] sm:$0xff]  ;;  %v74_v4 = vld [vmem:[#allocation7 + $0x10] sm:$0xff]  ;;  %v75_v6 = vld [vmem:[#allocation7 + $0x18] sm:$0xff]  ;;  %s757_s24 = smov [#allocation10]  }
  0x4b   :  { %564 = vmatprep.subr.bf16.mxu1 %v754_v0  ;;  %502 = vmatprep.mubr.msk.f32.mxu1 %vm755_vm0, %v756_v1  ;;  %v541_v5 = vpack.c.bf16 %v73_v3, %v72_v2  ;;  %v544_v7 = vpack.c.bf16 %v75_v6, %v74_v4  ;;  %v76_v8 = vld [vmem:[#allocation7 + $0x20] sm:$0xff]  ;;  %v77_v9 = vld [vmem:[#allocation7 + $0x28] sm:$0xff]  ;;  %v78_v11 = vld [vmem:[#allocation7 + $0x30] sm:$0xff]  ;;  %s367_s25 = sshll.u32 %s757_s24, 4  ;;  %s368_s25 = int_to_ptr.vmem [resolvable:$true] %s367_s25 }
  0x4c   :  { %v547_v10 = vpack.c.bf16 %v77_v9, %v76_v8  ;;  %v79_v12 = vld [vmem:[#allocation7 + $0x38] sm:$0xff]  ;;  %v80_v14 = vld [vmem:[#allocation7 + $0x40] sm:$0xff]  ;;  %v81_v15 = vld [vmem:[#allocation7 + $0x48] sm:$0xff]  ;;  %s718_s26 = scalar_lea.vmem %s368_s25, 128  ;;  %p723_p5 = scmp.lt.s32.totalorder %s368_s25, %s368_s25 }
  0x4d   :  { %542 = vmatpush3.bf16.msra.mxu0 %v541_v5  ;;  %v550_v13 = vpack.c.bf16 %v79_v12, %v78_v11  ;;  %v553_v16 = vpack.c.bf16 %v81_v15, %v80_v14  ;;  %v82_v17 = vld [vmem:[#allocation7 + $0x50] sm:$0xff]  ;;  %v83_v18 = vld [vmem:[#allocation7 + $0x58] sm:$0xff]  ;;  %v84_v20 = vld [vmem:[#allocation7 + $0x60] sm:$0xff]  ;;  %p719_p4 = scmp.ne.s32.totalorder %s368_s25, %s718_s26  ;;  %p724_p6 = scmp.lt.s32.totalorder %s718_s26, %s718_s26 }
  0x4e   :  { %543 = vmatprep.subr.bf16.mxu0 %v754_v0  ;;  %v556_v19 = vpack.c.bf16 %v83_v18, %v82_v17  ;;  %v85_v21 = vld [vmem:[#allocation7 + $0x68] sm:$0xff]  ;;  %v88_v23 = vld [vmem:[#allocation2] sm:$0xff]  ;;  %v87_v26 = vld [vmem:[#allocation7 + $0x78] sm:$0xff] }
  0x4f   :  { %v559_v22 = vpack.c.bf16 %v85_v21, %v84_v20  ;;  %v378_v24 = vld [vmem:[%s899_s4] ss:$0 sm:$0xff]  ;;  %v188_v30 = vld [vmem:[#allocation8] sm:$0xff]  ;;  %v189_v31 = vld [vmem:[#allocation8 + $0x8] sm:$0xff]  ;;  %p725_p7 = por %p724_p6, %p723_p5 }
  0x50   :  { %v86_v25 = vld [vmem:[#allocation7 + $0x70] sm:$0xff]  ;;  %v849_v27 = vadd.f32 %v378_v24, %v88_v23  ;;  %v565_v33 = vpack.c.bf16 %v189_v31, %v188_v30  ;;  %v191_v34 = vld [vmem:[#allocation8 + $0x18] sm:$0xff]  ;;  %v192_v36 = vld [vmem:[#allocation8 + $0x20] sm:$0xff] }
  0x51   :  { %545 = vmatpush3.bf16.msra.mxu0 %v544_v7  ;;  %v562_v28 = vpack.c.bf16 %v87_v26, %v86_v25  ;;  %v190_v32 = vld [vmem:[#allocation8 + $0x10] sm:$0xff]  ;;  %v193_v37 = vld [vmem:[#allocation8 + $0x28] sm:$0xff]  ;;  %v195_v40 = vld [vmem:[#allocation8 + $0x38] sm:$0xff]  ;;  %p726_p8 = pnand %p725_p7, %p719_p4 }
  0x52   :  { %546 = vmatprep.subr.bf16.mxu0 %v754_v0  ;;  %v95_v29 = vmul.f32 %v849_v27, %v849_v27  ;;  %566 = vmatpush3.bf16.msra.mxu1 %v565_v33  ;;  %v568_v35 = vpack.c.bf16 %v191_v34, %v190_v32  ;;  %v571_v38 = vpack.c.bf16 %v193_v37, %v192_v36  ;;  %v194_v39 = vld [vmem:[#allocation8 + $0x30] sm:$0xff]  ;;  %v196_v42 = vld [vmem:[#allocation8 + $0x40] sm:$0xff]  ;;  %v197_v43 = vld [vmem:[#allocation8 + $0x48] sm:$0xff] }
  0x53   :  { %567 = vmatprep.subr.bf16.mxu1 %v754_v0  ;;  %v574_v41 = vpack.c.bf16 %v195_v40, %v194_v39  ;;  %v577_v44 = vpack.c.bf16 %v197_v43, %v196_v42  ;;  %v198_v45 = vld [vmem:[#allocation8 + $0x50] sm:$0xff]  ;;  %v199_v46 = vld [vmem:[#allocation8 + $0x58] sm:$0xff]  ;;  %v200_v48 = vld [vmem:[#allocation8 + $0x60] sm:$0xff] }
  0x54   :  { %v580_v47 = vpack.c.bf16 %v199_v46, %v198_v45  ;;  %v201_v49 = vld [vmem:[#allocation8 + $0x68] sm:$0xff]  ;;  %v202_v51 = vld [vmem:[#allocation8 + $0x70] sm:$0xff]  ;;  %v203_v52 = vld [vmem:[#allocation8 + $0x78] sm:$0xff] }
  0x55   :  { %548 = vmatpush3.bf16.msra.mxu0 %v547_v10  ;;  %v583_v50 = vpack.c.bf16 %v201_v49, %v200_v48  ;;  %v586_v53 = vpack.c.bf16 %v203_v52, %v202_v51  ;;  %v379_v58 = vld [vmem:[%s899_s4 + $0x1] ss:$0 sm:$0xff]  ;;  %v380_v60 = vld [vmem:[%s899_s4 + $0x2] ss:$0 sm:$0xff]  ;;  %v382_v14 = vld [vmem:[%s899_s4 + $0x3] ss:$0 sm:$0xff] }
  0x56   :  { %549 = vmatprep.subr.bf16.mxu0 %v754_v0  ;;  %569 = vmatpush3.bf16.msra.mxu1 %v568_v35 }
  0x57   :  { %570 = vmatprep.subr.bf16.mxu1 %v754_v0 }
  0x59   :  { %551 = vmatpush3.bf16.msra.mxu0 %v550_v13 }
  0x5a   :  { %552 = vmatprep.subr.bf16.mxu0 %v754_v0  ;;  %572 = vmatpush3.bf16.msra.mxu1 %v571_v38 }
  0x5b   :  { %573 = vmatprep.subr.bf16.mxu1 %v754_v0 }
  0x5d   :  { %554 = vmatpush3.bf16.msra.mxu0 %v553_v16 }
  0x5e   :  { %555 = vmatprep.subr.bf16.mxu0 %v754_v0  ;;  %575 = vmatpush3.bf16.msra.mxu1 %v574_v41 }
  0x5f   :  { %576 = vmatprep.subr.bf16.mxu1 %v754_v0 }
  0x61   :  { %557 = vmatpush3.bf16.msra.mxu0 %v556_v19 }
  0x62   :  { %558 = vmatprep.subr.bf16.mxu0 %v754_v0  ;;  %578 = vmatpush3.bf16.msra.mxu1 %v577_v44 }
  0x63   :  { %579 = vmatprep.subr.bf16.mxu1 %v754_v0 }
  0x65   :  { %560 = vmatpush3.bf16.msra.mxu0 %v559_v22 }
  0x66   :  { %561 = vmatprep.subr.bf16.mxu0 %v754_v0  ;;  %581 = vmatpush3.bf16.msra.mxu1 %v580_v47 }
  0x67   :  { %582 = vmatprep.subr.bf16.mxu1 %v754_v0 }
  0x69   :  { %563 = vmatpush3.bf16.msra.mxu0 %v562_v28 }
  0x6a   :  { %588 = vmatprep.subr.bf16.mxu0 %v754_v0  ;;  %584 = vmatpush3.bf16.msra.mxu1 %v583_v50 }
  0x6b   :  { %585 = vmatprep.subr.bf16.mxu1 %v754_v0 }
  0x6c   :  { %468 = vmatmul.mubr.f32.vlgmr.msra.gmra.mrb[0].mxu0 %v95_v29 }
  0x6d   :  { %590 = vmatpush3.bf16.msra.mxu0 %v541_v5  ;;  %537 = vmatprep.mubr.msk.f32.mxu0 %vm755_vm0, %v756_v1  ;;  %v204_v5 = vld [vmem:[#allocation5] sm:$0xff] }
  0x6e   :  { %591 = vmatprep.subr.bf16.mxu0 %v754_v0  ;;  %587 = vmatpush3.bf16.msra.mxu1 %v586_v53 }
  0x71   :  { %593 = vmatpush3.bf16.msra.mxu0 %v544_v7 }
  0x72   :  { %594 = vmatprep.subr.bf16.mxu0 %v754_v0 }
  0x75   :  { %596 = vmatpush3.bf16.msra.mxu0 %v547_v10 }
  0x76   :  { %597 = vmatprep.subr.bf16.mxu0 %v754_v0 }
  0x79   :  { %599 = vmatpush3.bf16.msra.mxu0 %v550_v13 }
  0x7a   :  { %600 = vmatprep.subr.bf16.mxu0 %v754_v0 }
  0x7d   :  { %602 = vmatpush3.bf16.msra.mxu0 %v553_v16  ;;  %v383_v16 = vld [vmem:[%s899_s4 + $0x4] ss:$0 sm:$0xff] }
  0x7e   :  { %603 = vmatprep.subr.bf16.mxu0 %v754_v0 }
  0x81   :  { %605 = vmatpush3.bf16.msra.mxu0 %v556_v19 }
  0x82   :  { %606 = vmatprep.subr.bf16.mxu0 %v754_v0 }
  0x85   :  { %608 = vmatpush3.bf16.msra.mxu0 %v559_v22 }
  0x86   :  { %609 = vmatprep.subr.bf16.mxu0 %v754_v0 }
  0x89   :  { %611 = vmatpush3.bf16.msra.mxu0 %v562_v28 }
 0x13f   :  { %v162_v54 = vpop.f32.mrb[0].mxu0 }
 0x140   :  { %v163_v55 = vadd.f32 1e-05, %v162_v54  ;;  %v469_v56 = vpop.f32.mrb[1].mxu0 }
 0x142   :  { %622 = vrsqrt.f32 %v163_v55 }
 0x14c   :  { %v623_v57 = vpop.eup %622 }
 0x14d   :  { %v167_v59 = vmul.f32 %v623_v57, %v849_v27 }
 0x14f   :  { %v173_v61 = vmul.f32 %v379_v58, %v167_v59 }
 0x151   :  { %v179_v62 = vadd.f32 %v380_v60, %v173_v61 }
 0x153   :  { %v381_v63 = vmul.f32 -1.702, %v179_v62 }
 0x155   :  { %v182_v0 = vmul.f32 1.442695, %v381_v63 }
 0x157   :  { %624 = vpow2.f32 %v182_v0 }
 0x161   :  { %v625_v1 = vpop.eup %624 }
 0x162   :  { %v184_v2 = vadd.f32 1.0, %v625_v1 }
 0x164   :  { %626 = vrcp.f32 %v184_v2 }
 0x16e   :  { %v627_v3 = vpop.eup %626 }
 0x16f   :  { %v187_v4 = vmul.f32 %v627_v3, %v179_v62 }
 0x171   :  { %503 = vmatmul.mubr.f32.vlgmr.msra.gmra.mrb[0].mxu1 %v187_v4 }
 0x244   :  { %v271_v6 = vpop.f32.mrb[0].mxu1 }
 0x245   :  { %v272_v7 = vadd.f32 %v271_v6, %v204_v5  ;;  %v504_v8 = vpop.f32.mrb[1].mxu1 }
 0x247   :  { %v275_v9 = vmul.f32 %v272_v7, %v272_v7 }
 0x249   :  { %538 = vmatmul.mubr.f32.vlgmr.msra.gmra.mrb[2].mxu0 %v275_v9 }
 0x31c   :  { %v342_v10 = vpop.f32.mrb[2].mxu0 }
 0x31d   :  { %v343_v11 = vadd.f32 1e-12, %v342_v10  ;;  %v539_v12 = vpop.f32.mrb[3].mxu0 }
 0x31f   :  { %628 = vrsqrt.f32 %v343_v11 }
 0x329   :  { %v629_v13 = vpop.eup %628 }
 0x32a   :  { %v347_v15 = vmul.f32 %v629_v13, %v272_v7 }
 0x32c   :  { %v353_v17 = vmul.f32 %v382_v14, %v347_v15 }
 0x32e   :  { %v359_v18 = vadd.f32 %v383_v16, %v353_v17 }
 0x330   :  { %360 = vst [vmem:[#allocation10] sm:$0xff] %v359_v18 }
 0x331   :  { %729 = shalt.err (!%p726_p8)
}
 0x332   :  { %s730_s27 = scalar_lea.hbm %s900_s5, 128 }
 0x333   :  { %p731_p9 = scmp.ne.s32.totalorder %s900_s5, %s730_s27  ;;  %p734_p10 = scmp.lt.u32.totalorder %s730_s27, %s900_s5 }
 0x335   :  { %p736_p11 = pnand %p734_p10, %p731_p9 }
 0x337   :  { %739 = shalt.err (!%p736_p11)
}
 0x338   :  { %370 = dma.vmem_to_hbm [thread:$0]  %s368_s25, 128, %s900_s5, [#allocation4]  }
 0x339   :  { %746 = dma.done.wait [#allocation4], 128  }
 0x33a   :  { %747 = vsyncadd [#allocation4], 4294967168 }
 0x33b   :  { %374 = vsyncpa [#allocation3], 1 }
 0x33c   :  { %375 = vsyncpa [#allocation6], 1 }
 0x33d   :  { %376 = vsyncpa [#allocation9], 1 }
 0x33e   :  { %377 = vsyncpa [#allocation4], 1 }

</bundles_post_ra>
